<compile_context>
chip_gen: v7x
topology: tpu7x:2x2x1
jax: 0.10.0
libtpu: 0.0.40
codegen_flags: <defaults>
</compile_context>

<pallas_src>
import functools

import jax
import jax.numpy as jnp
import numpy as np
from jax.experimental import pallas as pl
from jax.experimental.pallas import tpu as pltpu


def _decoder_kernel(x_ref, wqkv_ref, wo_ref, bo_ref, wl_ref, bl_ref, o_ref,
                    y_sc, *, n_head: int):
    """One grid step: (batch tile b, vocab tile v).

    x_ref   : (Bb, T, C)   bf16 embedded tokens
    wqkv_ref: (C, 3C)      bf16 (pre-transposed)
    wo_ref  : (C, C)       bf16 (pre-transposed)
    bo_ref  : (1, C)       f32
    wl_ref  : (C, Vt)      bf16 (pre-transposed vocab tile)
    bl_ref  : (1, Vt)      f32
    o_ref   : (Bb, T, Vt)  f32 logits tile
    y_sc    : (Bb*T, C)    f32 scratch holding the attention block output,
                           computed at v==0 and reused across vocab tiles.
    """
    v_idx = pl.program_id(1)

    @pl.when(v_idx == 0)
    def _compute_attention():
        Bb, T, C = x_ref.shape
        Dh = C // n_head
        scale = 1.0 / np.sqrt(Dh)

        x = x_ref[...].reshape(Bb * T, C)                          # bf16 (Bb*T, C)

        # QKV projection: weight already (C, 3C) -> no in-kernel transpose.
        qkv = jnp.dot(x, wqkv_ref[...],
                      preferred_element_type=jnp.float32)          # (Bb*T, 3C) f32

        # Causal mask, built once per batch tile.
        row = jax.lax.broadcasted_iota(jnp.int32, (T, T), 0)
        col = jax.lax.broadcasted_iota(jnp.int32, (T, T), 1)
        causal = col <= row                                        # (T, T)

        # Unrolled per-(batch, head) 2-D attention: keeps C on the lane axis and
        # avoids the (T,H,Dh)<->(H,T,Dh) relayout copies of batched einsums.
        y_rows = []
        for b in range(Bb):
            r0 = b * T
            head_outs = []
            for h in range(n_head):
                c0 = h * Dh
                q_h = qkv[r0:r0 + T, c0:c0 + Dh].astype(jnp.bfloat16)
                k_h = qkv[r0:r0 + T, C + c0:C + c0 + Dh].astype(jnp.bfloat16)
                v_h = qkv[r0:r0 + T, 2 * C + c0:2 * C + c0 + Dh].astype(jnp.bfloat16)

                # q @ k^T via dot_general contracting the last axis of both
                # operands (no explicit .T / XLU transpose).
                att = jax.lax.dot_general(
                    q_h, k_h, (((1,), (1,)), ((), ())),
                    preferred_element_type=jnp.float32) * scale    # (T, T) f32
                att = jnp.where(causal, att, -jnp.inf)
                att = att - jnp.max(att, axis=-1, keepdims=True)
                p = jnp.exp(att)
                p = p * pl.reciprocal(jnp.sum(p, axis=-1, keepdims=True),
                                      approx=True)                 # EUP vrcp
                # TODO(synk): F.dropout (p=0.5, training=True in the reference)
                # is treated as identity (eval semantics).

                y_h = jnp.dot(p.astype(jnp.bfloat16), v_h,
                              preferred_element_type=jnp.float32)  # (T, Dh) f32
                head_outs.append(y_h)
            y_rows.append(jnp.concatenate(head_outs, axis=-1))     # (T, C)
        y = jnp.concatenate(y_rows, axis=0)                        # (Bb*T, C)

        # Output projection (Wo pre-transposed to (C, C) in->out) + bias.
        y_sc[...] = (jnp.dot(y.astype(jnp.bfloat16), wo_ref[...],
                             preferred_element_type=jnp.float32)
                     + bo_ref[...])
        # TODO(synk): second F.dropout (inplace, p=0.5) also treated as identity.

    # Vocab projection for this 128-aligned vocab tile; runs for every v tile
    # and reuses the attention output held in y_sc.
    Bb, T, Vt = o_ref.shape
    logits = (jnp.dot(y_sc[...].astype(jnp.bfloat16), wl_ref[...],
                      preferred_element_type=jnp.float32)
              + bl_ref[...])                                       # (Bb*T, Vt)
    o_ref[...] = logits.reshape(Bb, T, Vt).astype(o_ref.dtype)


def fake_decoder_forward(tokens, emb_table, wqkv, wo, bo, wl, bl, *,
                         n_head: int, block_b=None, v_tile: int = 128):
    """Forward pass matching FakeDecoder (dropout = identity).

    tokens: (B, T) int32; emb_table: (V, C); wqkv: (3C, C); wo: (C, C);
    bo: (C,); wl: (V, C); bl: (V,).  Returns (B, T, V) f32 logits.
    """
    B, T = tokens.shape
    V, C = emb_table.shape
    assert C % n_head == 0

    # --- glue: embedding lookup (gather) in plain JAX, cast to bf16 ---
    x_emb = jnp.take(emb_table, tokens, axis=0).astype(jnp.bfloat16)   # (B, T, C)

    # --- pre-transpose weights once (PyTorch (out,in) -> (in,out)), cast bf16 ---
    wqkv_t = wqkv.T.astype(jnp.bfloat16)                               # (C, 3C)
    wo_t = wo.T.astype(jnp.bfloat16)                                   # (C, C)
    bo2 = bo.reshape(1, C).astype(jnp.float32)

    # --- pad vocab to a lane-dense multiple of the (128-aligned) vocab tile ---
    assert v_tile % 128 == 0
    Vp = ((V + v_tile - 1) // v_tile) * v_tile
    wl_t = jnp.zeros((C, Vp), jnp.bfloat16).at[:, :V].set(wl.T.astype(jnp.bfloat16))
    bl_p = jnp.zeros((1, Vp), jnp.float32).at[:, :V].set(bl.astype(jnp.float32))

    # --- rows-per-step: pack batch elements so the MXU M dim is tall, but keep
    #     >=2 "parallel" grid steps when possible (v7x has 2 TensorCores) ---
    if block_b is None:
        block_b = max(1, min(B, 256 // max(T, 1)))
        if B >= 2 and B // block_b < 2:
            block_b = max(1, B // 2)
    while B % block_b:
        block_b -= 1

    nb = B // block_b
    nv = Vp // v_tile

    kernel = functools.partial(_decoder_kernel, n_head=n_head)

    out = pl.pallas_call(
        kernel,
        out_shape=jax.ShapeDtypeStruct((B, T, Vp), jnp.float32),
        grid_spec=pltpu.PrefetchScalarGridSpec(
            num_scalar_prefetch=0,
            grid=(nb, nv),                       # vocab (reuse) axis last
            in_specs=[
                pl.BlockSpec((block_b, T, C), lambda b, v: (b, 0, 0)),   # x
                pl.BlockSpec((C, 3 * C), lambda b, v: (0, 0)),           # Wqkv^T
                pl.BlockSpec((C, C), lambda b, v: (0, 0)),               # Wo^T
                pl.BlockSpec((1, C), lambda b, v: (0, 0)),               # bo
                pl.BlockSpec((C, v_tile), lambda b, v: (0, v)),          # Wl^T tile
                pl.BlockSpec((1, v_tile), lambda b, v: (0, v)),          # bl tile
            ],
            out_specs=pl.BlockSpec((block_b, T, v_tile), lambda b, v: (b, 0, v)),
            scratch_shapes=[pltpu.VMEM((block_b * T, C), jnp.float32)],
        ),
        compiler_params=pltpu.CompilerParams(
            dimension_semantics=("parallel", "arbitrary"),
            # Explicit scoped-VMEM budget; 48 MiB fits v5e/v6e (128 MiB physical)
            # and leaves headroom on v7x (64 MiB physical). Tiles here are tiny;
            # for real vocabs pick v_tile so 2x-buffered (C, v_tile) bf16 fits.
            vmem_limit_bytes=48 * 1024 * 1024,
        ),
        # TODO(synk): the invariant Wqkv/Wo/bo specs could request
        # pipeline_mode=pl.Buffered(1) to avoid reserving a second buffer; they
        # are small relative to the Wl tile so left at the default here.
    )(x_emb, wqkv_t, wo_t, bo2, wl_t, bl_p)

    return out[:, :, :V]


def reference_forward(tokens, emb_table, wqkv, wo, bo, wl, bl, *, n_head: int):
    """Pure-JAX f32 reference mirroring the PyTorch module (dropout = identity)."""
    B, T = tokens.shape
    V, C = emb_table.shape
    Dh = C // n_head
    x = jnp.take(emb_table, tokens, axis=0)                 # (B, T, C)
    qkv = x @ wqkv.T                                        # (B, T, 3C)
    q, k, v = jnp.split(qkv, 3, axis=-1)

    def to_heads(t):
        return t.reshape(B, T, n_head, Dh).transpose(0, 2, 1, 3)  # (B,H,T,Dh)

    q, k, v = to_heads(q), to_heads(k), to_heads(v)
    att = (q @ k.transpose(0, 1, 3, 2)) / np.sqrt(Dh)       # (B,H,T,T)
    mask = jnp.tril(jnp.ones((T, T), bool))[None, None]
    att = jnp.where(mask, att, -jnp.inf)
    att = jax.nn.softmax(att, axis=-1)
    y = att @ v                                             # (B,H,T,Dh)
    y = y.transpose(0, 2, 1, 3).reshape(B, T, C)
    y = y @ wo.T + bo
    return y @ wl.T + bl


if __name__ == "__main__":
    # Small config consistent with the module.
    B, T, C, H, V = 2, 8, 32, 4, 64

    key = jax.random.PRNGKey(0)
    k_emb, k_qkv, k_wo, k_bo, k_wl, k_bl, k_tok = jax.random.split(key, 7)

    emb_table = jax.random.normal(k_emb, (V, C), jnp.float32) * 0.1
    wqkv = jax.random.normal(k_qkv, (3 * C, C), jnp.float32) * 0.1
    wo = jax.random.normal(k_wo, (C, C), jnp.float32) * 0.1
    bo = jax.random.normal(k_bo, (C,), jnp.float32) * 0.1
    wl = jax.random.normal(k_wl, (V, C), jnp.float32) * 0.1
    bl = jax.random.normal(k_bl, (V,), jnp.float32) * 0.1

    tokens = jax.random.randint(k_tok, (B, T), 0, V, jnp.int32)

    out = fake_decoder_forward(tokens, emb_table, wqkv, wo, bo, wl, bl, n_head=H)
    out = jax.block_until_ready(out)

    ref = reference_forward(tokens, emb_table, wqkv, wo, bo, wl, bl, n_head=H)
    # bf16 matmul inputs + approx reciprocal -> loosened tolerance vs. f32 ref.
    np.testing.assert_allclose(np.asarray(out), np.asarray(ref),
                               rtol=2e-2, atol=2e-2)

    print("KERNEL_OK")
</pallas_src>

<mosaic_0001>
module attributes {stable_mosaic.version = 11 : i64} {
  func.func @_decoder_kernel(%arg0: i32, %arg1: i32, %arg2: memref<1x8x32xbf16, #tpu.memory_space<vmem>>, %arg3: memref<32x96xbf16, #tpu.memory_space<vmem>>, %arg4: memref<32x32xbf16, #tpu.memory_space<vmem>>, %arg5: memref<1x32xf32, #tpu.memory_space<vmem>>, %arg6: memref<32x128xbf16, #tpu.memory_space<vmem>>, %arg7: memref<1x128xf32, #tpu.memory_space<vmem>>, %arg8: memref<1x8x128xf32, #tpu.memory_space<vmem>>, %arg9: memref<8x32xf32, #tpu.memory_space<vmem>>) attributes {dimension_semantics = [#tpu.dimension_semantics<parallel>, #tpu.dimension_semantics<arbitrary>], iteration_bounds = array<i64: 2, 1>, scalar_prefetch = 0 : i64, scratch_operands = 1 : i64, tpu.core_type = #tpu.core_type<tc>, window_params = [{transform_indices = @transform_0, window_bounds = array<i64: 1, 8, 32>}, {pipeline_mode = #tpu.pipeline_mode<synchronous>, transform_indices = @transform_1, window_bounds = array<i64: 32, 96>}, {pipeline_mode = #tpu.pipeline_mode<synchronous>, transform_indices = @transform_2, window_bounds = array<i64: 32, 32>}, {pipeline_mode = #tpu.pipeline_mode<synchronous>, transform_indices = @transform_3, window_bounds = array<i64: 1, 32>}, {transform_indices = @transform_4, window_bounds = array<i64: 32, 128>}, {transform_indices = @transform_5, window_bounds = array<i64: 1, 128>}, {transform_indices = @transform_6, window_bounds = array<i64: 1, 8, 128>}]} {
    %c0_i32 = arith.constant 0 : i32
    %0 = arith.cmpi eq, %arg1, %c0_i32 : i32
    %1 = arith.extui %0 : i1 to i32
    %c0_i32_0 = arith.constant 0 : i32
    %2 = arith.cmpi ne, %1, %c0_i32_0 : i32
    scf.if %2 {
      %c0_9 = arith.constant 0 : index
      %c0_10 = arith.constant 0 : index
      %c0_11 = arith.constant 0 : index
      %12 = vector.load %arg2[%c0_9, %c0_10, %c0_11] : memref<1x8x32xbf16, #tpu.memory_space<vmem>>, vector<1x8x32xbf16>
      %13 = vector.shape_cast %12 : vector<1x8x32xbf16> to vector<8x32xbf16>
      %c0_12 = arith.constant 0 : index
      %c0_13 = arith.constant 0 : index
      %14 = vector.load %arg3[%c0_12, %c0_13] : memref<32x96xbf16, #tpu.memory_space<vmem>>, vector<32x96xbf16>
      %cst_14 = arith.constant dense<0.000000e+00> : vector<8x96xf32>
      %15 = tpu.matmul %13, %14, %cst_14 {dimension_numbers = #tpu.dot_dimension_numbers<[1], [0], [0], [1], [0, 0, 1, 1], [], []>} : vector<8x32xbf16>, vector<32x96xbf16>, vector<8x96xf32> -> vector<8x96xf32>
      %16 = tpu.iota {dimensions = array<i32: 0>} : vector<8x8xi32>
      %17 = tpu.iota {dimensions = array<i32: 1>} : vector<8x8xi32>
      %18 = arith.cmpi sle, %17, %16 : vector<8x8xi32>
      %19 = vector.extract_strided_slice %15 {offsets = [0, 0], sizes = [8, 8], strides = [1, 1]} : vector<8x96xf32> to vector<8x8xf32>
      %20 = arith.truncf %19 : vector<8x8xf32> to vector<8x8xbf16>
      %21 = vector.extract_strided_slice %15 {offsets = [0, 32], sizes = [8, 8], strides = [1, 1]} : vector<8x96xf32> to vector<8x8xf32>
      %22 = arith.truncf %21 : vector<8x8xf32> to vector<8x8xbf16>
      %23 = vector.extract_strided_slice %15 {offsets = [0, 64], sizes = [8, 8], strides = [1, 1]} : vector<8x96xf32> to vector<8x8xf32>
      %24 = arith.truncf %23 : vector<8x8xf32> to vector<8x8xbf16>
      %cst_15 = arith.constant dense<0.000000e+00> : vector<8x8xf32>
      %25 = tpu.matmul %20, %22, %cst_15 {dimension_numbers = #tpu.dot_dimension_numbers<[1], [1], [0], [0], [0, 0, 1, 0], [], []>} : vector<8x8xbf16>, vector<8x8xbf16>, vector<8x8xf32> -> vector<8x8xf32>
      %cst_16 = arith.constant 0.353553385 : f32
      %26 = vector.broadcast %cst_16 : f32 to vector<8x8xf32>
      %27 = arith.mulf %25, %26 : vector<8x8xf32>
      %cst_17 = arith.constant 0xFF800000 : f32
      %28 = vector.broadcast %cst_17 : f32 to vector<8x8xf32>
      %29 = arith.select %18, %27, %28 : vector<8x8xi1>, vector<8x8xf32>
      %cst_18 = arith.constant dense<0xFF800000> : vector<8xf32>
      %30 = vector.multi_reduction <maximumf>, %29, %cst_18 [1] : vector<8x8xf32> to vector<8xf32>
      %31 = vector.shape_cast %30 : vector<8xf32> to vector<8x1xf32>
      %32 = vector.broadcast %31 : vector<8x1xf32> to vector<8x8xf32>
      %33 = arith.subf %29, %32 : vector<8x8xf32>
      %34 = math.exp %33 : vector<8x8xf32>
      %cst_19 = arith.constant dense<0.000000e+00> : vector<8xf32>
      %35 = vector.multi_reduction <add>, %34, %cst_19 [1] : vector<8x8xf32> to vector<8xf32>
      %36 = vector.shape_cast %35 : vector<8xf32> to vector<8x1xf32>
      %37 = tpu.reciprocal %36 {approx = true} : vector<8x1xf32> -> vector<8x1xf32>
      %38 = vector.broadcast %37 : vector<8x1xf32> to vector<8x8xf32>
      %39 = arith.mulf %34, %38 : vector<8x8xf32>
      %40 = arith.truncf %39 : vector<8x8xf32> to vector<8x8xbf16>
      %cst_20 = arith.constant dense<0.000000e+00> : vector<8x8xf32>
      %41 = tpu.matmul %40, %24, %cst_20 {dimension_numbers = #tpu.dot_dimension_numbers<[1], [0], [0], [1], [0, 0, 1, 1], [], []>} : vector<8x8xbf16>, vector<8x8xbf16>, vector<8x8xf32> -> vector<8x8xf32>
      %42 = vector.extract_strided_slice %15 {offsets = [0, 8], sizes = [8, 8], strides = [1, 1]} : vector<8x96xf32> to vector<8x8xf32>
      %43 = arith.truncf %42 : vector<8x8xf32> to vector<8x8xbf16>
      %44 = vector.extract_strided_slice %15 {offsets = [0, 40], sizes = [8, 8], strides = [1, 1]} : vector<8x96xf32> to vector<8x8xf32>
      %45 = arith.truncf %44 : vector<8x8xf32> to vector<8x8xbf16>
      %46 = vector.extract_strided_slice %15 {offsets = [0, 72], sizes = [8, 8], strides = [1, 1]} : vector<8x96xf32> to vector<8x8xf32>
      %47 = arith.truncf %46 : vector<8x8xf32> to vector<8x8xbf16>
      %cst_21 = arith.constant dense<0.000000e+00> : vector<8x8xf32>
      %48 = tpu.matmul %43, %45, %cst_21 {dimension_numbers = #tpu.dot_dimension_numbers<[1], [1], [0], [0], [0, 0, 1, 0], [], []>} : vector<8x8xbf16>, vector<8x8xbf16>, vector<8x8xf32> -> vector<8x8xf32>
      %cst_22 = arith.constant 0.353553385 : f32
      %49 = vector.broadcast %cst_22 : f32 to vector<8x8xf32>
      %50 = arith.mulf %48, %49 : vector<8x8xf32>
      %cst_23 = arith.constant 0xFF800000 : f32
      %51 = vector.broadcast %cst_23 : f32 to vector<8x8xf32>
      %52 = arith.select %18, %50, %51 : vector<8x8xi1>, vector<8x8xf32>
      %cst_24 = arith.constant dense<0xFF800000> : vector<8xf32>
      %53 = vector.multi_reduction <maximumf>, %52, %cst_24 [1] : vector<8x8xf32> to vector<8xf32>
      %54 = vector.shape_cast %53 : vector<8xf32> to vector<8x1xf32>
      %55 = vector.broadcast %54 : vector<8x1xf32> to vector<8x8xf32>
      %56 = arith.subf %52, %55 : vector<8x8xf32>
      %57 = math.exp %56 : vector<8x8xf32>
      %cst_25 = arith.constant dense<0.000000e+00> : vector<8xf32>
      %58 = vector.multi_reduction <add>, %57, %cst_25 [1] : vector<8x8xf32> to vector<8xf32>
      %59 = vector.shape_cast %58 : vector<8xf32> to vector<8x1xf32>
      %60 = tpu.reciprocal %59 {approx = true} : vector<8x1xf32> -> vector<8x1xf32>
      %61 = vector.broadcast %60 : vector<8x1xf32> to vector<8x8xf32>
      %62 = arith.mulf %57, %61 : vector<8x8xf32>
      %63 = arith.truncf %62 : vector<8x8xf32> to vector<8x8xbf16>
      %cst_26 = arith.constant dense<0.000000e+00> : vector<8x8xf32>
      %64 = tpu.matmul %63, %47, %cst_26 {dimension_numbers = #tpu.dot_dimension_numbers<[1], [0], [0], [1], [0, 0, 1, 1], [], []>} : vector<8x8xbf16>, vector<8x8xbf16>, vector<8x8xf32> -> vector<8x8xf32>
      %65 = vector.extract_strided_slice %15 {offsets = [0, 16], sizes = [8, 8], strides = [1, 1]} : vector<8x96xf32> to vector<8x8xf32>
      %66 = arith.truncf %65 : vector<8x8xf32> to vector<8x8xbf16>
      %67 = vector.extract_strided_slice %15 {offsets = [0, 48], sizes = [8, 8], strides = [1, 1]} : vector<8x96xf32> to vector<8x8xf32>
      %68 = arith.truncf %67 : vector<8x8xf32> to vector<8x8xbf16>
      %69 = vector.extract_strided_slice %15 {offsets = [0, 80], sizes = [8, 8], strides = [1, 1]} : vector<8x96xf32> to vector<8x8xf32>
      %70 = arith.truncf %69 : vector<8x8xf32> to vector<8x8xbf16>
      %cst_27 = arith.constant dense<0.000000e+00> : vector<8x8xf32>
      %71 = tpu.matmul %66, %68, %cst_27 {dimension_numbers = #tpu.dot_dimension_numbers<[1], [1], [0], [0], [0, 0, 1, 0], [], []>} : vector<8x8xbf16>, vector<8x8xbf16>, vector<8x8xf32> -> vector<8x8xf32>
      %cst_28 = arith.constant 0.353553385 : f32
      %72 = vector.broadcast %cst_28 : f32 to vector<8x8xf32>
      %73 = arith.mulf %71, %72 : vector<8x8xf32>
      %cst_29 = arith.constant 0xFF800000 : f32
      %74 = vector.broadcast %cst_29 : f32 to vector<8x8xf32>
      %75 = arith.select %18, %73, %74 : vector<8x8xi1>, vector<8x8xf32>
      %cst_30 = arith.constant dense<0xFF800000> : vector<8xf32>
      %76 = vector.multi_reduction <maximumf>, %75, %cst_30 [1] : vector<8x8xf32> to vector<8xf32>
      %77 = vector.shape_cast %76 : vector<8xf32> to vector<8x1xf32>
      %78 = vector.broadcast %77 : vector<8x1xf32> to vector<8x8xf32>
      %79 = arith.subf %75, %78 : vector<8x8xf32>
      %80 = math.exp %79 : vector<8x8xf32>
      %cst_31 = arith.constant dense<0.000000e+00> : vector<8xf32>
      %81 = vector.multi_reduction <add>, %80, %cst_31 [1] : vector<8x8xf32> to vector<8xf32>
      %82 = vector.shape_cast %81 : vector<8xf32> to vector<8x1xf32>
      %83 = tpu.reciprocal %82 {approx = true} : vector<8x1xf32> -> vector<8x1xf32>
      %84 = vector.broadcast %83 : vector<8x1xf32> to vector<8x8xf32>
      %85 = arith.mulf %80, %84 : vector<8x8xf32>
      %86 = arith.truncf %85 : vector<8x8xf32> to vector<8x8xbf16>
      %cst_32 = arith.constant dense<0.000000e+00> : vector<8x8xf32>
      %87 = tpu.matmul %86, %70, %cst_32 {dimension_numbers = #tpu.dot_dimension_numbers<[1], [0], [0], [1], [0, 0, 1, 1], [], []>} : vector<8x8xbf16>, vector<8x8xbf16>, vector<8x8xf32> -> vector<8x8xf32>
      %88 = vector.extract_strided_slice %15 {offsets = [0, 24], sizes = [8, 8], strides = [1, 1]} : vector<8x96xf32> to vector<8x8xf32>
      %89 = arith.truncf %88 : vector<8x8xf32> to vector<8x8xbf16>
      %90 = vector.extract_strided_slice %15 {offsets = [0, 56], sizes = [8, 8], strides = [1, 1]} : vector<8x96xf32> to vector<8x8xf32>
      %91 = arith.truncf %90 : vector<8x8xf32> to vector<8x8xbf16>
      %92 = vector.extract_strided_slice %15 {offsets = [0, 88], sizes = [8, 8], strides = [1, 1]} : vector<8x96xf32> to vector<8x8xf32>
      %93 = arith.truncf %92 : vector<8x8xf32> to vector<8x8xbf16>
      %cst_33 = arith.constant dense<0.000000e+00> : vector<8x8xf32>
      %94 = tpu.matmul %89, %91, %cst_33 {dimension_numbers = #tpu.dot_dimension_numbers<[1], [1], [0], [0], [0, 0, 1, 0], [], []>} : vector<8x8xbf16>, vector<8x8xbf16>, vector<8x8xf32> -> vector<8x8xf32>
      %cst_34 = arith.constant 0.353553385 : f32
      %95 = vector.broadcast %cst_34 : f32 to vector<8x8xf32>
      %96 = arith.mulf %94, %95 : vector<8x8xf32>
      %cst_35 = arith.constant 0xFF800000 : f32
      %97 = vector.broadcast %cst_35 : f32 to vector<8x8xf32>
      %98 = arith.select %18, %96, %97 : vector<8x8xi1>, vector<8x8xf32>
      %cst_36 = arith.constant dense<0xFF800000> : vector<8xf32>
      %99 = vector.multi_reduction <maximumf>, %98, %cst_36 [1] : vector<8x8xf32> to vector<8xf32>
      %100 = vector.shape_cast %99 : vector<8xf32> to vector<8x1xf32>
      %101 = vector.broadcast %100 : vector<8x1xf32> to vector<8x8xf32>
      %102 = arith.subf %98, %101 : vector<8x8xf32>
      %103 = math.exp %102 : vector<8x8xf32>
      %cst_37 = arith.constant dense<0.000000e+00> : vector<8xf32>
      %104 = vector.multi_reduction <add>, %103, %cst_37 [1] : vector<8x8xf32> to vector<8xf32>
      %105 = vector.shape_cast %104 : vector<8xf32> to vector<8x1xf32>
      %106 = tpu.reciprocal %105 {approx = true} : vector<8x1xf32> -> vector<8x1xf32>
      %107 = vector.broadcast %106 : vector<8x1xf32> to vector<8x8xf32>
      %108 = arith.mulf %103, %107 : vector<8x8xf32>
      %109 = arith.truncf %108 : vector<8x8xf32> to vector<8x8xbf16>
      %cst_38 = arith.constant dense<0.000000e+00> : vector<8x8xf32>
      %110 = tpu.matmul %109, %93, %cst_38 {dimension_numbers = #tpu.dot_dimension_numbers<[1], [0], [0], [1], [0, 0, 1, 1], [], []>} : vector<8x8xbf16>, vector<8x8xbf16>, vector<8x8xf32> -> vector<8x8xf32>
      %111 = tpu.concatenate %41, %64, %87, %110 in 1 : vector<8x8xf32>, vector<8x8xf32>, vector<8x8xf32>, vector<8x8xf32> -> vector<8x32xf32>
      %112 = arith.truncf %111 : vector<8x32xf32> to vector<8x32xbf16>
      %c0_39 = arith.constant 0 : index
      %c0_40 = arith.constant 0 : index
      %113 = vector.load %arg4[%c0_39, %c0_40] : memref<32x32xbf16, #tpu.memory_space<vmem>>, vector<32x32xbf16>
      %cst_41 = arith.constant dense<0.000000e+00> : vector<8x32xf32>
      %114 = tpu.matmul %112, %113, %cst_41 {dimension_numbers = #tpu.dot_dimension_numbers<[1], [0], [0], [1], [0, 0, 1, 1], [], []>} : vector<8x32xbf16>, vector<32x32xbf16>, vector<8x32xf32> -> vector<8x32xf32>
      %c0_42 = arith.constant 0 : index
      %c0_43 = arith.constant 0 : index
      %115 = vector.load %arg5[%c0_42, %c0_43] : memref<1x32xf32, #tpu.memory_space<vmem>>, vector<1x32xf32>
      %116 = vector.broadcast %115 : vector<1x32xf32> to vector<8x32xf32>
      %117 = arith.addf %114, %116 : vector<8x32xf32>
      %c0_44 = arith.constant 0 : index
      %c0_45 = arith.constant 0 : index
      %118 = vector.load %arg9[%c0_44, %c0_45] : memref<8x32xf32, #tpu.memory_space<vmem>>, vector<8x32xf32>
      tpu.vector_store %arg9[%c0_44, %c0_45], %117 {strides = array<i32>} : memref<8x32xf32, #tpu.memory_space<vmem>>, vector<8x32xf32>,
    } else {
    }
    %c0 = arith.constant 0 : index
    %c0_1 = arith.constant 0 : index
    %3 = vector.load %arg9[%c0, %c0_1] : memref<8x32xf32, #tpu.memory_space<vmem>>, vector<8x32xf32>
    %4 = arith.truncf %3 : vector<8x32xf32> to vector<8x32xbf16>
    %c0_2 = arith.constant 0 : index
    %c0_3 = arith.constant 0 : index
    %5 = vector.load %arg6[%c0_2, %c0_3] : memref<32x128xbf16, #tpu.memory_space<vmem>>, vector<32x128xbf16>
    %cst = arith.constant dense<0.000000e+00> : vector<8x128xf32>
    %6 = tpu.matmul %4, %5, %cst {dimension_numbers = #tpu.dot_dimension_numbers<[1], [0], [0], [1], [0, 0, 1, 1], [], []>} : vector<8x32xbf16>, vector<32x128xbf16>, vector<8x128xf32> -> vector<8x128xf32>
    %c0_4 = arith.constant 0 : index
    %c0_5 = arith.constant 0 : index
    %7 = vector.load %arg7[%c0_4, %c0_5] : memref<1x128xf32, #tpu.memory_space<vmem>>, vector<1x128xf32>
    %8 = vector.broadcast %7 : vector<1x128xf32> to vector<8x128xf32>
    %9 = arith.addf %6, %8 : vector<8x128xf32>
    %10 = vector.shape_cast %9 : vector<8x128xf32> to vector<1x8x128xf32>
    %c0_6 = arith.constant 0 : index
    %c0_7 = arith.constant 0 : index
    %c0_8 = arith.constant 0 : index
    %11 = vector.load %arg8[%c0_6, %c0_7, %c0_8] : memref<1x8x128xf32, #tpu.memory_space<vmem>>, vector<1x8x128xf32>
    tpu.vector_store %arg8[%c0_6, %c0_7, %c0_8], %10 {strides = array<i32>} : memref<1x8x128xf32, #tpu.memory_space<vmem>>, vector<1x8x128xf32>,
    return
  }
  func.func @transform_0(%arg0: i32, %arg1: i32) -> (i32, i32, i32) {
    %c0_i32 = arith.constant 0 : i32
    %c0_i32_0 = arith.constant 0 : i32
    %c0_i32_1 = arith.constant 0 : i32
    return %arg0, %c0_i32, %c0_i32_0 : i32, i32, i32
  }
  func.func @transform_1(%arg0: i32, %arg1: i32) -> (i32, i32) {
    %c0_i32 = arith.constant 0 : i32
    %c0_i32_0 = arith.constant 0 : i32
    %c0_i32_1 = arith.constant 0 : i32
    return %c0_i32, %c0_i32_0 : i32, i32
  }
  func.func @transform_2(%arg0: i32, %arg1: i32) -> (i32, i32) {
    %c0_i32 = arith.constant 0 : i32
    %c0_i32_0 = arith.constant 0 : i32
    %c0_i32_1 = arith.constant 0 : i32
    return %c0_i32, %c0_i32_0 : i32, i32
  }
  func.func @transform_3(%arg0: i32, %arg1: i32) -> (i32, i32) {
    %c0_i32 = arith.constant 0 : i32
    %c0_i32_0 = arith.constant 0 : i32
    %c0_i32_1 = arith.constant 0 : i32
    return %c0_i32, %c0_i32_0 : i32, i32
  }
  func.func @transform_4(%arg0: i32, %arg1: i32) -> (i32, i32) {
    %c0_i32 = arith.constant 0 : i32
    %c0_i32_0 = arith.constant 0 : i32
    return %c0_i32, %arg1 : i32, i32
  }
  func.func @transform_5(%arg0: i32, %arg1: i32) -> (i32, i32) {
    %c0_i32 = arith.constant 0 : i32
    %c0_i32_0 = arith.constant 0 : i32
    return %c0_i32, %arg1 : i32, i32
  }
  func.func @transform_6(%arg0: i32, %arg1: i32) -> (i32, i32, i32) {
    %c0_i32 = arith.constant 0 : i32
    %c0_i32_0 = arith.constant 0 : i32
    return %arg0, %c0_i32, %arg1 : i32, i32, i32
  }
}

</mosaic_0001>

<bundles_post_ra>
// kernel: tpu_custom_call.1
= control target key start
LH: loop header
LB: loop body
LE: loop exit
PB: predicated region body
PF: predicated region fallthrough
CT: control target
= control target key end

     0   :  { %s2066_s0 = inlined_call_operand.hbm [shape: bf16[2,8,32], index: 0, kind: input, shape index: {}]   ;;  %s2067_s1 = inlined_call_operand.hbm [shape: bf16[32,96], index: 1, kind: input, shape index: {}]   ;;  %s2068_s2 = inlined_call_operand.hbm [shape: bf16[32,32], index: 2, kind: input, shape index: {}]   ;;  %s2069_s3 = inlined_call_operand.vmem [shape: f32[1,32], index: 3, kind: input, shape index: {}]   ;;  %s2070_s4 = inlined_call_operand.hbm [shape: bf16[32,128], index: 4, kind: input, shape index: {}]   ;;  %s2071_s5 = inlined_call_operand.vmem [shape: f32[1,128], index: 5, kind: input, shape index: {}]   ;;  %s2072_s6 = inlined_call_operand.hbm [shape: f32[2,8,128], index: 6, kind: output, shape index: {}]  }
   0x1   :  { %2080 = sst [smem:[#allocation18_spill]] %s2072_s6 }
   0x2   :  { %11 = vsyncpa [#allocation4], 0 }
   0x3   :  { %13 = vsyncpa [#allocation4 + $0x1], 0 }
   0x4   :  { %14 = vsyncpa [#allocation7], 0 }
   0x5   :  { %15 = vsyncpa [#allocation10], 0 }
   0x6   :  { %16 = vsyncpa [#allocation5], 0 }
   0x7   :  { %18 = vsyncpa [#allocation5 + $0x1], 0  ;;  %s1692_s21 = smov 0   ;;  %s1694_s22 = smov 0  }
   0x8   :  { %s1696_s23 = smov 0   ;;  %s1698_s24 = smov 0  }
   0x9   :  { %s1700_s25 = smov 0   ;;  %s1702_s26 = smov 0  }
   0xa LB: > { %2081 = sst [smem:[#allocation16_spill]] %s1612_s21  ;;  %s1159_s27 = sadd.s32 4294967295, %s1632_s26   ;;  %s1632_s26 = sphi %s1702_s26, %s24_s26   ;;  %s1628_s25 = sphi %s1700_s25, %s2105_s25   ;;  %s1624_s24 = sphi %s1698_s24, %s2104_s24   ;;  %s1620_s23 = sphi %s1696_s23, %s2103_s23   ;;  %s1616_s22 = sphi %s1694_s22, %s2102_s22   ;;  %s1612_s21 = sphi %s1692_s21, %s2101_s21  }
   0xb   : > { %s1160_s28 = sadd.s32 4294967294, %s1632_s26   ;;  %p56_p0 = scmp.ne.s32.totalorder %s1616_s22, %s1612_s21 }
   0xc   : > { %p1726_p1 = scmp.eq.s32.totalorder %s1159_s27, 0  ;;  %p1730_p2 = scmp.eq.s32.totalorder %s1159_s27, 1 }
   0xd   : > { %p203_p3 = scmp.eq.s32.totalorder %s1160_s28, 1  ;;  %p1161_p5 = scmp.ge.s32.totalorder %s1632_s26, 1 }
   0xe   : > { %s2082_s29 = scalar_select %p1726_p1, 1, 0 }
   0xf   : > { %s2083_s30 = scalar_select %p1730_p2, 1, 0 }
  0x10   : > { %p1736_p4 = por %p1726_p1, %p56_p0  ;;  %p1741_p6 = por %p203_p3, %p56_p0 }
  0x11   : > { %p210_p7 = scmp.lt.s32.totalorder %s1632_s26, 3  ;;  %s1634_s10 = smov [#allocation6]  }
  0x12   : > { %s2084_s7 = scalar_select %p1736_p4, 1, 0 }
  0x13   : > { %s2085_s8 = scalar_select %p1741_p6, 1, 0 }
  0x14   : > { %p1746_p8 = pnand %p1161_p5, %p210_p7  ;;  %s222_s11 = sshll.u32 %s1634_s10, 4  ;;  %s1750_s11 = int_to_ptr.vmem [resolvable:$true] %s222_s11 }
  0x15   : > { %2086 = sst [smem:[#allocation17_spill]] %s2085_s8  ;;  %s1635_s13 = smov [#allocation8]  }
  0x16   : > { %s2087_s9 = scalar_select %p1746_p8, 1, 0 }
  0x17   : > { %p1311_p9 = pneg %p1746_p8  ;;  %s235_s14 = sshll.u32 %s1635_s13, 4  ;;  %s1761_s14 = int_to_ptr.vmem [resolvable:$true] %s235_s14 }
  0x18   : > { %s1636_s15 = smov [#allocation9]   ;;  %s1428_s19 = scalar_lea.hbm %s2067_s1, 256 }
  0x19   : > { %p1757_p11 = pnand %p1311_p9, %p1726_p1  ;;  %s1763_s16 = sshll.u32 %s1636_s15, 4  ;;  %s254_s16 = int_to_ptr.vmem [resolvable:$true] %s1763_s16 }
  0x1a   : > { %p1429_p12 = scmp.ne.s32.totalorder %s2067_s1, %s1428_s19  ;;  %p1435_p5 = scmp.lt.u32.totalorder %s1428_s19, %s2067_s1 }
  0x1b   : > { %p1773_p13 = pneg %p1757_p11 }
  0x1d   : > { %p1431_p0 = pnand %p1773_p13, %p1429_p12 }
  0x1f   : > { %p1432_p3 = pneg %p1431_p0 }
  0x21   : > { %p1437_p7 = pnand %p1435_p5, %p1432_p3 }
  0x23   : > { %1440 = shalt.err (!%p1437_p7)
}
  0x24   : > { %s1441_s15 = scalar_lea.vmem %s1750_s11, 256  ;;  %p1449_p1 = scmp.lt.s32.totalorder %s1750_s11, %s1750_s11 }
  0x25   : > { %p1442_p9 = scmp.ne.s32.totalorder %s1750_s11, %s1441_s15  ;;  %p1450_p4 = scmp.lt.s32.totalorder %s1441_s15, %s1441_s15 }
  0x27   : > { %p1444_p10 = pnand %p1442_p9, %p1773_p13  ;;  %p1451_p12 = por %p1450_p4, %p1449_p1 }
  0x29   : > { %p1445_p6 = pneg %p1444_p10 }
  0x2b   : > { %p1452_p0 = pnand %p1451_p12, %p1445_p6 }
  0x2d   : > { %1455 = shalt.err (!%p1452_p0)
}
  0x2e   : > { %s1637_s17 = smov 64   ;;  %s1638_s18 = smov 4  }
  0x2f   : > { %1314 = dma.hbm_to_vmem [thread:$0]  (!%p1757_p11), %s2067_s1, 256, %s1750_s11, [#allocation7], %s1637_s17, %s1637_s17, %s1638_s18  }
  0x30   : > { %s1456_s13 = scalar_lea.hbm %s2068_s2, 256 }
  0x31   : > { %p1457_p1 = scmp.ne.s32.totalorder %s2068_s2, %s1456_s13  ;;  %p1463_p10 = scmp.lt.u32.totalorder %s1456_s13, %s2068_s2 }
  0x33   : > { %p1459_p4 = pnand %p1457_p1, %p1773_p13 }
  0x35   : > { %p1460_p6 = pneg %p1459_p4 }
  0x37   : > { %p1465_p3 = pnand %p1463_p10, %p1460_p6 }
  0x39   : > { %1468 = shalt.err (!%p1465_p3)
}
  0x3a   : > { %s1469_s11 = scalar_lea.vmem %s1761_s14, 256  ;;  %p1477_p12 = scmp.lt.s32.totalorder %s1761_s14, %s1761_s14 }
  0x3b   : > { %p1470_p5 = scmp.ne.s32.totalorder %s1761_s14, %s1469_s11  ;;  %p1478_p0 = scmp.lt.s32.totalorder %s1469_s11, %s1469_s11 }
  0x3d   : > { %p1472_p7 = pnand %p1470_p5, %p1773_p13  ;;  %p1479_p1 = por %p1478_p0, %p1477_p12 }
  0x3f   : > { %p1473_p9 = pneg %p1472_p7 }
  0x41   : > { %p1480_p4 = pnand %p1479_p1, %p1473_p9 }
  0x43   : > { %1483 = shalt.err (!%p1480_p4)
}
  0x44   : > { %1317 = dma.hbm_to_vmem [thread:$0]  (!%p1757_p11), %s2068_s2, 256, %s1761_s14, [#allocation7], %s1637_s17, %s1637_s17, %s1638_s18  }
  0x45   : > { %s1484_s20 = scalar_lea.hbm %s2070_s4, 256 }
  0x46   : > { %p1485_p6 = scmp.ne.s32.totalorder %s2070_s4, %s1484_s20  ;;  %p1491_p5 = scmp.lt.u32.totalorder %s1484_s20, %s2070_s4 }
  0x48   : > { %p1487_p10 = pnand %p1485_p6, %p1773_p13 }
  0x4a   : > { %p1488_p3 = pneg %p1487_p10 }
  0x4c   : > { %p1493_p7 = pnand %p1491_p5, %p1488_p3 }
  0x4e   : > { %1496 = shalt.err (!%p1493_p7)
}
  0x4f   : > { %s1497_s11 = scalar_lea.vmem %s254_s16, 256  ;;  %p1505_p1 = scmp.lt.s32.totalorder %s254_s16, %s254_s16 }
  0x50   : > { %p1498_p9 = scmp.ne.s32.totalorder %s254_s16, %s1497_s11  ;;  %p1506_p4 = scmp.lt.s32.totalorder %s1497_s11, %s1497_s11 }
  0x52   : > { %p1500_p12 = pnand %p1498_p9, %p1773_p13  ;;  %p1507_p8 = por %p1506_p4, %p1505_p1 }
  0x54   : > { %p1501_p0 = pneg %p1500_p12 }
  0x56   : > { %p1508_p2 = pnand %p1507_p8, %p1501_p0 }
  0x58   : > { %1511 = shalt.err (!%p1508_p2)
}
  0x59   : > { %1320 = dma.hbm_to_vmem [thread:$0]  (!%p1757_p11), %s2070_s4, 256, %s254_s16, [#allocation10], %s1637_s17, %s1637_s17, %s1638_s18  }
  0x5a   : > { %s43_s28 = sadd.s32 1, %s1620_s23  ;;  %s36_s12 = sadd.s32 1, %s1628_s25 }
  0x5b   : > { %p50_p2 = scmp.ne.s32.totalorder %s1620_s23, %s1616_s22  ;;  %p38_p8 = scmp.ge.s32.totalorder %s36_s12, 2 }
  0x5c   : > { %p51_p13 = scmp.eq.s32.totalorder %s1632_s26, 0  ;;  %p2090_p6 = scmp.ne.s32.totalorder %s2083_s30, 0 }
  0x5d   : > { %p1332_p3 = scmp.lt.s32.totalorder %s1632_s26, 2  ;;  %s2107_s12 = smov (%p38_p8, %s36_s12), 0 }
  0x5e   : > { %p1852_p10 = por %p2090_p6, %p50_p2  ;;  %p52_p5 = por %p51_p13, %p50_p2 }
  0x5f   : > { %s273_s8 = sand.u32 1, %s1620_s23   ;;  %s40_s19 = ssub.s32 %s1628_s25, %s2107_s12 }
  0x60   : > { %p41_p7 = scmp.eq.s32.totalorder %s40_s19, 0  ;;  %s1167_s16 = sshll.u32 %s273_s8, 2 }
  0x61   : > { %s1168_s17 = sshll.u32 %s1628_s25, 6  ;;  %s277_s10 = scalar_lea.vmem [#allocation3], %s1167_s16 }
  0x62   : > { %s1864_s18 = scalar_select %p41_p7, %s1620_s23, %s43_s28  }
  0x63   : > { %s1869_s30 = scalar_lea.hbm %s2066_s0, %s1168_s17  ;;  %s284_s13 = sshll.u32 %s277_s10, 4  ;;  %s1871_s13 = int_to_ptr.vmem [resolvable:$true] %s284_s13 }
  0x64   : > { %p1875_p11 = pnand %p1332_p3, %p52_p5  ;;  %s274_s11 = scalar_lea.sflag [#allocation4], %s273_s8 }
  0x65   : > { %s1512_s14 = scalar_lea.hbm %s1869_s30, 64  ;;  %s1517_s19 = scalar_lea.hbm %s2066_s0, 128 }
  0x66   : > { %p1513_p9 = scmp.ne.s32.totalorder %s1869_s30, %s1512_s14  ;;  %p1514_p12 = pneg %p1875_p11 }
  0x67   : > { %p1518_p4 = scmp.lt.u32.totalorder %s1869_s30, %s2066_s0  ;;  %p1519_p2 = scmp.lt.u32.totalorder %s1517_s19, %s1512_s14 }
  0x68   : > { %p1515_p0 = pnand %p1514_p12, %p1513_p9  ;;  %p1521_p13 = scmp.lt.u32.totalorder %s1512_s14, %s1869_s30 }
  0x69   : > { %p1520_p8 = por %p1519_p2, %p1518_p4 }
  0x6a   : > { %p1516_p1 = pneg %p1515_p0 }
  0x6b   : > { %p1522_p6 = por %p1521_p13, %p1520_p8 }
  0x6d   : > { %p1523_p3 = pnand %p1522_p6, %p1516_p1 }
  0x6f   : > { %1526 = shalt.err (!%p1523_p3)
}
  0x70   : > { %s1527_s8 = scalar_lea.vmem %s1871_s13, 64  ;;  %s1639_s20 = smov [#allocation3]  }
  0x71   : > { %p1528_p5 = scmp.ne.s32.totalorder %s1871_s13, %s1527_s8  ;;  %s1532_s27 = sshll.u32 %s1639_s20, 4  ;;  %s1533_s27 = int_to_ptr.vmem [resolvable:$false] %s1532_s27 }
  0x72   : > { %s1534_s10 = scalar_lea.vmem %s1533_s27, 128  ;;  %p1535_p0 = scmp.lt.s32.totalorder %s1871_s13, %s1533_s27 }
  0x73   : > { %p1530_p7 = pnand %p1528_p5, %p1514_p12  ;;  %p1536_p4 = scmp.lt.s32.totalorder %s1534_s10, %s1527_s8 }
  0x75   : > { %p1531_p9 = pneg %p1530_p7  ;;  %p1537_p2 = por %p1536_p4, %p1535_p0 }
  0x77   : > { %p1538_p8 = pnand %p1537_p2, %p1531_p9 }
  0x79   : > { %1541 = shalt.err (!%p1538_p8)
}
  0x7a   : > { %1324 = dma.hbm_to_vmem [thread:$0]  (!%p1875_p11), %s1869_s30, 64, %s1871_s13, %s274_s11  }
  0x7b   : > { %p2093_p1 = scmp.ne.s32.totalorder %s2087_s9, 0 }
  0x7c   : > { %s1907_s14 = sand.u32 (!%p2093_p1), 1, %s1616_s22   ;;  %p2094_p12 = scmp.ne.s32.totalorder (!%p2093_p1), %s2084_s7, 0 }
  0x7d   : > { %293 = sbr.rel (%p2093_p1) target bundleno = 1860 (0x744), region = 44  ;;  %s1170_s6 = sshll.u32 (!%p2093_p1), %s1907_s14, 2 }
  0x7e   : > { %s296_s28 = scalar_lea.sflag (!%p2093_p1), [#allocation4], %s1907_s14  ;;  %s299_s19 = scalar_lea.vmem (!%p2093_p1), [#allocation3], %s1170_s6 }
  0x84   : > { %1595 = dma.done.wait (%p2094_p12), %s296_s28, 64  }
  0x85   : > { %1597 = vsyncadd (%p2094_p12), %s296_s28, 4294967232  ;;  %p2095_p13 = scmp.ne.s32.totalorder %s2082_s29, 0 }
  0x87   : > { %1599 = dma.done.wait (%p2095_p13), [#allocation7], 512  }
  0x88   : > { %1601 = vsyncadd (%p2095_p13), [#allocation7], 4294966784 }
  0x89   : > { %1603 = dma.done.wait (%p2095_p13), [#allocation10], 256  }
  0x8a   : > { %1605 = vsyncadd (%p2095_p13), [#allocation10], 4294967040  ;;  %v1640_v0 = vmov 0.0   ;;  %vm1641_vm0 = vmmov 0   ;;  %v1406_v1 = vld [vmem:[#allocation6] sm:$0xff]   ;;  %v1407_v2 = vld [vmem:[#allocation6 + $0x8] sm:$0xff]   ;;  %v412_v20 = vlaneseq }
  0x8b   : > { %1223 = vmatprep.subr.bf16.mxu0 %v1640_v0  ;;  %1227 = vmatprep.mubr.msk.bf16.mxu0 %vm1641_vm0, %v1640_v0  ;;  %v351_v3 = vld [vmem:[%s299_s19] sm:$0xf]  ;;  %vm368_vm1 = vcmask 261120   ;;  %s1642_s29 = smov 120   ;;  %s1643_s7 = smov 96   ;;  %vm421_vm2 = vcmask 64512  }
  0x8c   : > { %1231 = vmatprep.subr.bf16.mxu1 %v1640_v0  ;;  %1233 = vmatprep.mubr.msk.bf16.mxu1 %vm1641_vm0, %v1640_v0  ;;  %s1644_s9 = smov 80   ;;  %s1645_s30 = smov 88   ;;  %v413_v21 = vshrl.u32 %v412_v20, 7  ;;  %v415_v22 = vand.u32 127, %v412_v20  ;;  %vm487_vm4 = vcmask 1043456   ;;  %vm880_vm5 = vcmask 130048  }
  0x8d   : > { %1224 = vmatpush3.bf16.msra.mxu0 %v1406_v1  ;;  %s1646_s13 = smov 72   ;;  %s1647_s15 = smov 112   ;;  %vm882_vm6 = vcmask 195584  }
  0x8e   : > { %1225 = vmatprep.subr.bf16.mxu0 %v1640_v0  ;;  %s1648_s11 = smov 104   ;;  %vm416_vm3 = vcmp.le.s32.totalorder %v415_v22, %v413_v21  ;;  %s1649_s16 = smov 56  }
  0x8f   : > { %s1650_s17 = smov 64   ;;  %s1651_s8 = smov 40  }
  0x90   : > { %s1652_s20 = smov 48   ;;  %s1653_s27 = smov 8  }
  0x91   : > { %1226 = vmatpush3.bf16.msra.mxu0 %v1407_v2  ;;  %s1654_s10 = smov 16   ;;  %s1655_s6 = smov 24  }
  0x92   : > { %1237 = vmatprep.subr.bf16.mxu0 %v1640_v0 }
  0x94   : > { %1228 = vmatmul.mubr.msk.bf16.vlgmr.msra.gmra.mrb[0].mxu0 %vm368_vm1, %v351_v3 }
  0x95   : > { %1239 = vmatprep.mubr.msk.bf16.mxu0 %vm1641_vm0, %v1640_v0 }
 0x167   : > { %v406_v4 = vpop.f32.mrb[0].mxu0 }
 0x168   : > { %v1934_v5 = vpack.c.bf16 %v406_v4, %v406_v4  ;;  %v1229_v6 = vpop.f32.mrb[1].mxu0 }
 0x169   : > { %v409_v7 = vpop.f32.mrb[2].mxu0 }
 0x16a   : > { %531 = vrot.lane.b32.xlu1 %v1934_v5, %s1642_s29  ;;  %419 = vrot.lane.b32.xlu0 %v1934_v5, %s1643_s7  ;;  %v1230_v8 = vpop.f32.mrb[3].mxu0  ;;  %s1174_s29 = sshll.u32 %s1907_s14, 3 }
 0x16e   : > { %645 = vrot.lane.b32.xlu1 %v1934_v5, %s1644_s9  ;;  %533 = vrot.lane.b32.xlu0 %v1934_v5, %s1645_s30  ;;  %s1195_s30 = sshll.u32 %s1624_s24, 7 }
 0x172   : > { %757 = vrot.lane.b32.xlu1 %v1934_v5, %s1646_s13  ;;  %643 = vrot.lane.b32.xlu0 %v1934_v5, %s1647_s15  ;;  %s342_s13 = scalar_lea.vmem [#allocation11], %s1174_s29 }
 0x173   : > { %s1037_s15 = sshll.u32 %s342_s13, 4  ;;  %s2019_s15 = int_to_ptr.vmem [resolvable:$true] %s1037_s15 }
 0x174   : > { %s1542_s24 = scalar_lea.vmem %s2019_s15, 128 }
 0x175   : > { %p1543_p11 = scmp.ne.s32.totalorder %s2019_s15, %s1542_s24 }
 0x176   : > { %755 = vrot.lane.b32.xlu0 %v1934_v5, %s1648_s11 }
 0x177   : > { %p1544_p6 = pnand %p1543_p11, %p1852_p10 }
 0x179   : > { %p1545_p3 = pneg %p1544_p6 }
 0x1dc   : > { %v420_v9 = vpop.permute.xlu0 %419  ;;  %v532_v12 = vpop.permute.xlu1 %531 }
 0x1dd   : > { %v426_v10 = vsel %vm421_vm2, %v420_v9, 0 }
 0x1de   : > { %1232 = vmatpush3.bf16.xpose.msra.mxu1 %v426_v10 }
 0x1df   : > { %1243 = vmatprep.subr.bf16.mxu1 %v1640_v0 }
 0x1e0   : > { %v534_v11 = vpop.permute.xlu0 %533  ;;  %v646_v14 = vpop.permute.xlu1 %645 }
 0x1e1   : > { %v539_v13 = vsel %vm421_vm2, %v534_v11, 0  ;;  %v651_v15 = vsel %vm421_vm2, %v646_v14, 0 }
 0x1e4   : > { %v758_v16 = vpop.permute.xlu1 %757  ;;  %v644_v17 = vpop.permute.xlu0 %643 }
 0x1e5   : > { %1234 = vmatmul.mubr.msk.bf16.vlgmr.msra.gmra.mrb[0].mxu1 %vm421_vm2, %v1934_v5  ;;  %v763_v18 = vsel %vm421_vm2, %v758_v16, 0 }
 0x1e6   : > { %1244 = vmatpush3.bf16.xpose.msra.mxu1 %v539_v13  ;;  %1245 = vmatprep.mubr.msk.bf16.mxu1 %vm1641_vm0, %v1640_v0 }
 0x1e7   : > { %1255 = vmatprep.subr.bf16.mxu1 %v1640_v0 }
 0x1e8   : > { %v756_v19 = vpop.permute.xlu0 %755 }
 0x1ed   : > { %1246 = vmatmul.mubr.msk.bf16.vlgmr.msra.gmra.mrb[4].mxu1 %vm421_vm2, %v532_v12 }
 0x1ee   : > { %1256 = vmatpush3.bf16.xpose.msra.mxu1 %v651_v15  ;;  %1257 = vmatprep.mubr.msk.bf16.mxu1 %vm1641_vm0, %v1640_v0 }
 0x1ef   : > { %1267 = vmatprep.subr.bf16.mxu1 %v1640_v0 }
 0x1f5   : > { %1258 = vmatmul.mubr.msk.bf16.vlgmr.msra.gmra.mrb[8].mxu1 %vm421_vm2, %v644_v17 }
 0x1f6   : > { %1268 = vmatpush3.bf16.xpose.msra.mxu1 %v763_v18  ;;  %1269 = vmatprep.mubr.msk.bf16.mxu1 %vm1641_vm0, %v1640_v0 }
 0x1f7   : > { %1279 = vmatprep.subr.bf16.mxu1 %v1640_v0 }
 0x1fd   : > { %1270 = vmatmul.mubr.msk.bf16.vlgmr.msra.gmra.mrb[12].mxu1 %vm421_vm2, %v756_v19 }
 0x1fe   : > { %1283 = vmatprep.mubr.msk.bf16.mxu1 %vm1641_vm0, %v1640_v0 }
 0x2b8   : > { %v462_v23 = vpop.f32.mrb[0].mxu1 }
 0x2b9   : > { %v468_v24 = vmul.f32 0.35355338, %v462_v23  ;;  %v1235_v25 = vpop.f32.mrb[1].mxu1 }
 0x2ba   : > { %v465_v26 = vpop.f32.mrb[2].mxu1 }
 0x2bb   : > { %v1236_v27 = vpop.f32.mrb[3].mxu1  ;;  %v469_v28 = vsel %vm416_vm3, %v468_v24, -inf }
 0x2bc   : > { %v470_v29 = vsel %vm421_vm2, %v469_v28, -inf }
 0x2bd   : > { %471 = vmax.xlane.f32.xlu1 %v470_v29 }
 0x2c0   : > { %v575_v30 = vpop.f32.mrb[4].mxu1 }
 0x2c1   : > { %v581_v31 = vmul.f32 0.35355338, %v575_v30  ;;  %v1247_v32 = vpop.f32.mrb[5].mxu1 }
 0x2c2   : > { %v578_v33 = vpop.f32.mrb[6].mxu1 }
 0x2c3   : > { %v1248_v34 = vpop.f32.mrb[7].mxu1  ;;  %v582_v35 = vsel %vm416_vm3, %v581_v31, -inf }
 0x2c4   : > { %v583_v36 = vsel %vm421_vm2, %v582_v35, -inf }
 0x2c5   : > { %584 = vmax.xlane.f32.xlu0 %v583_v36 }
 0x2c8   : > { %v687_v37 = vpop.f32.mrb[8].mxu1 }
 0x2c9   : > { %v693_v38 = vmul.f32 0.35355338, %v687_v37  ;;  %v1259_v39 = vpop.f32.mrb[9].mxu1 }
 0x2ca   : > { %v690_v40 = vpop.f32.mrb[10].mxu1 }
 0x2cb   : > { %v1260_v41 = vpop.f32.mrb[11].mxu1  ;;  %v694_v42 = vsel %vm416_vm3, %v693_v38, -inf  ;;  %v1408_v40 = vld [vmem:[#allocation8] sm:$0xff]  }
 0x2cc   : > { %v695_v43 = vsel %vm421_vm2, %v694_v42, -inf  ;;  %1280 = vmatpush3.bf16.msra.mxu1 %v1408_v40  ;;  %v1409_v41 = vld [vmem:[#allocation8 + $0x8] sm:$0xff]  }
 0x2cd   : > { %696 = vmax.xlane.f32.xlu0 %v695_v43  ;;  %1281 = vmatprep.subr.bf16.mxu1 %v1640_v0 }
 0x2d0   : > { %v799_v44 = vpop.f32.mrb[12].mxu1  ;;  %1282 = vmatpush3.bf16.msra.mxu1 %v1409_v41 }
 0x2d1   : > { %v805_v45 = vmul.f32 0.35355338, %v799_v44  ;;  %v1271_v46 = vpop.f32.mrb[13].mxu1 }
 0x2d2   : > { %v802_v47 = vpop.f32.mrb[14].mxu1 }
 0x2d3   : > { %v1272_v48 = vpop.f32.mrb[15].mxu1  ;;  %v806_v49 = vsel %vm416_vm3, %v805_v45, -inf }
 0x2d4   : > { %v807_v50 = vsel %vm421_vm2, %v806_v49, -inf }
 0x2d5   : > { %808 = vmax.xlane.f32.xlu1 %v807_v50 }
 0x34a   : > { %v472_v51 = vpop.xlane.xlu1 %471 }
 0x34b   : > { %v473_v52 = vsub.f32 %v469_v28, %v472_v51 }
 0x34d   : > { %v474_v53 = vmul.f32 1.442695, %v473_v52 }
 0x34f   : > { %1412 = vpow2.f32 %v474_v53 }
 0x352   : > { %v585_v54 = vpop.xlane.xlu0 %584 }
 0x353   : > { %v586_v55 = vsub.f32 %v582_v35, %v585_v54 }
 0x355   : > { %v587_v56 = vmul.f32 1.442695, %v586_v55 }
 0x357   : > { %1414 = vpow2.f32 %v587_v56 }
 0x359   : > { %v1413_v57 = vpop.eup %1412 }
 0x35a   : > { %v697_v58 = vpop.xlane.xlu0 %696  ;;  %v476_v59 = vsel %vm421_vm2, %v1413_v57, 0.0 }
 0x35b   : > { %v698_v60 = vsub.f32 %v694_v42, %v697_v58  ;;  %477 = vadd.xlane.f32.xlu0 %v476_v59  ;;  %v1411_v58 = vld [vmem:[#allocation9 + $0x8] sm:$0xff]   ;;  %v1186_v59 = vld [vmem:[%s2069_s3] ss:$0 sm:$0xff] }
 0x35d   : > { %v699_v61 = vmul.f32 1.442695, %v698_v60 }
 0x35f   : > { %1416 = vpow2.f32 %v699_v61 }
 0x361   : > { %v1415_v62 = vpop.eup %1414 }
 0x362   : > { %v589_v63 = vsel %vm421_vm2, %v1415_v62, 0.0  ;;  %v809_v3 = vpop.xlane.xlu1 %808 }
 0x363   : > { %590 = vadd.xlane.f32.xlu1 %v589_v63  ;;  %v810_v4 = vsub.f32 %v806_v49, %v809_v3 }
 0x365   : > { %v811_v6 = vmul.f32 1.442695, %v810_v4 }
 0x367   : > { %1418 = vpow2.f32 %v811_v6 }
 0x369   : > { %v1417_v1 = vpop.eup %1416 }
 0x36a   : > { %v701_v2 = vsel %vm421_vm2, %v1417_v1, 0.0 }
 0x36b   : > { %702 = vadd.xlane.f32.xlu0 %v701_v2 }
 0x371   : > { %v1419_v7 = vpop.eup %1418 }
 0x372   : > { %v813_v8 = vsel %vm421_vm2, %v1419_v7, 0.0 }
 0x374   : > { %595 = vrot.lane.b32.xlu1 %v1934_v5, %s1649_s16 }
 0x381   : > { %482 = vrot.lane.b32.xlu0 %v1934_v5, %s1650_s17  ;;  %s2096_s17 = sld [smem:[#allocation18_spill]] }
 0x385   : > { %819 = vrot.lane.b32.xlu0 %v1934_v5, %s1651_s8 }
 0x387   : > { %s2017_s8 = scalar_lea.hbm %s2096_s17, %s1195_s30 }
 0x398   : > { %814 = vadd.xlane.f32.xlu1 %v813_v8 }
 0x3a9   : > { %707 = vrot.lane.b32.xlu1 %v1934_v5, %s1652_s20  ;;  %s1023_s20 = scalar_lea.sflag [#allocation5], %s1907_s14 }
 0x3e8   : > { %v478_v9 = vpop.xlane.xlu0 %477 }
 0x3e9   : > { %1420 = vrcp.f32 %v478_v9 }
 0x3f0   : > { %v591_v10 = vpop.xlane.xlu1 %590 }
 0x3f1   : > { %1422 = vrcp.f32 %v591_v10 }
 0x3f3   : > { %v1421_v11 = vpop.eup %1420 }
 0x3f4   : > { %v480_v13 = vmul.f32 %v1421_v11, %v1413_v57  ;;  %v596_v16 = vpop.permute.xlu1 %595  ;;  %v1410_v57 = vld [vmem:[#allocation9] sm:$0xff]  }
 0x3f5   : > { %v601_v19 = vsel %vm487_vm4, %v596_v16, 0 }
 0x3f6   : > { %v481_v17 = vpack.c.bf16 %v480_v13, %v480_v13 }
 0x3f8   : > { %v703_v12 = vpop.xlane.xlu0 %702 }
 0x3f9   : > { %1424 = vrcp.f32 %v703_v12 }
 0x3fb   : > { %v1423_v18 = vpop.eup %1422 }
 0x3fc   : > { %v483_v14 = vpop.permute.xlu0 %482  ;;  %v593_v5 = vmul.f32 %v1423_v18, %v1415_v62 }
 0x3fd   : > { %v489_v15 = vsel %vm487_vm4, %v483_v14, 0 }
 0x3fe   : > { %1238 = vmatpush3.bf16.msra.mxu0 %v489_v15  ;;  %v594_v20 = vpack.c.bf16 %v593_v5, %v593_v5 }
 0x3ff   : > { %1249 = vmatprep.subr.bf16.mxu0 %v1640_v0 }
 0x400   : > { %v820_v26 = vpop.permute.xlu0 %819 }
 0x401   : > { %1240 = vmatmul.mubr.msk.bf16.vlgmr.msra.gmra.mrb[4].mxu0 %vm421_vm2, %v481_v17  ;;  %v825_v28 = vsel %vm487_vm4, %v820_v26, 0 }
 0x402   : > { %1250 = vmatpush3.bf16.msra.mxu0 %v601_v19  ;;  %1251 = vmatprep.mubr.msk.bf16.mxu0 %vm1641_vm0, %v1640_v0 }
 0x403   : > { %1261 = vmatprep.subr.bf16.mxu0 %v1640_v0  ;;  %v1425_v21 = vpop.eup %1424 }
 0x404   : > { %v705_v23 = vmul.f32 %v1425_v21, %v1417_v1 }
 0x406   : > { %v706_v27 = vpack.c.bf16 %v705_v23, %v705_v23 }
 0x409   : > { %1252 = vmatmul.mubr.msk.bf16.vlgmr.msra.gmra.mrb[8].mxu0 %vm421_vm2, %v594_v20 }
 0x40a   : > { %1263 = vmatprep.mubr.msk.bf16.mxu0 %vm1641_vm0, %v1640_v0 }
 0x425   : > { %v815_v22 = vpop.xlane.xlu1 %814 }
 0x426   : > { %1426 = vrcp.f32 %v815_v22 }
 0x429   : > { %v708_v24 = vpop.permute.xlu1 %707 }
 0x42a   : > { %v713_v25 = vsel %vm487_vm4, %v708_v24, 0 }
 0x42b   : > { %1262 = vmatpush3.bf16.msra.mxu0 %v713_v25 }
 0x42c   : > { %1273 = vmatprep.subr.bf16.mxu0 %v1640_v0 }
 0x42e   : > { %1264 = vmatmul.mubr.msk.bf16.vlgmr.msra.gmra.mrb[12].mxu0 %vm421_vm2, %v706_v27 }
 0x42f   : > { %1274 = vmatpush3.bf16.msra.mxu0 %v825_v28  ;;  %1275 = vmatprep.mubr.msk.bf16.mxu0 %vm1641_vm0, %v1640_v0 }
 0x430   : > { %v1427_v29 = vpop.eup %1426  ;;  %1287 = vmatprep.subr.bf16.mxu0 %v1640_v0 }
 0x431   : > { %v817_v30 = vmul.f32 %v1427_v29, %v1419_v7 }
 0x433   : > { %v818_v31 = vpack.c.bf16 %v817_v30, %v817_v30 }
 0x436   : > { %1276 = vmatmul.mubr.msk.bf16.vlgmr.msra.gmra.mrb[16].mxu0 %vm421_vm2, %v818_v31 }
 0x437   : > { %1291 = vmatprep.mubr.msk.bf16.mxu0 %vm1641_vm0, %v1640_v0  ;;  %1288 = vmatpush3.bf16.msra.mxu0 %v1410_v57 }
 0x438   : > { %1289 = vmatprep.subr.bf16.mxu0 %v1640_v0  ;;  %v1190_v0 = vld [vmem:[%s2071_s5] ss:$0 sm:$0xff] }
 0x43b   : > { %1290 = vmatpush3.bf16.msra.mxu0 %v1411_v58 }
 0x4d4   : > { %v525_v32 = vpop.f32.mrb[4].mxu0 }
 0x4d5   : > { %v1241_v33 = vpop.f32.mrb[5].mxu0 }
 0x4d6   : > { %v528_v34 = vpop.f32.mrb[6].mxu0 }
 0x4d7   : > { %v1242_v35 = vpop.f32.mrb[7].mxu0 }
 0x4dc   : > { %v637_v36 = vpop.f32.mrb[8].mxu0 }
 0x4dd   : > { %868 = vrot.lane.b32.xlu1 %v637_v36, %s1653_s27  ;;  %v1253_v37 = vpop.f32.mrb[9].mxu0  ;;  %s1656_s27 = smov [#allocation11]  }
 0x4de   : > { %v640_v38 = vpop.f32.mrb[10].mxu0 }
 0x4df   : > { %v1254_v39 = vpop.f32.mrb[11].mxu0 }
 0x501   : > { %v749_v42 = vpop.f32.mrb[12].mxu0 }
 0x502   : > { %872 = vrot.lane.b32.xlu0 %v749_v42, %s1654_s10  ;;  %v1265_v43 = vpop.f32.mrb[13].mxu0  ;;  %s1546_s10 = sshll.u32 %s1656_s27, 4  ;;  %s1547_s10 = int_to_ptr.vmem [resolvable:$false] %s1546_s10 }
 0x503   : > { %v752_v44 = vpop.f32.mrb[14].mxu0  ;;  %p1549_p5 = scmp.lt.s32.totalorder %s2019_s15, %s1547_s10 }
 0x504   : > { %v1266_v45 = vpop.f32.mrb[15].mxu0 }
 0x509   : > { %v861_v46 = vpop.f32.mrb[16].mxu0 }
 0x50a   : > { %876 = vrot.lane.b32.xlu1 %v861_v46, %s1655_s6  ;;  %v1277_v47 = vpop.f32.mrb[17].mxu0  ;;  %s1548_s6 = scalar_lea.vmem %s1547_s10, 256 }
 0x50b   : > { %v864_v48 = vpop.f32.mrb[18].mxu0  ;;  %p1550_p7 = scmp.lt.s32.totalorder %s1548_s6, %s1542_s24 }
 0x50c   : > { %v1278_v49 = vpop.f32.mrb[19].mxu0 }
 0x50d   : > { %p1551_p9 = por %p1550_p7, %p1549_p5 }
 0x50f   : > { %p1552_p0 = pnand %p1551_p9, %p1545_p3 }
 0x54f   : > { %v869_v50 = vpop.permute.xlu1 %868 }
 0x550   : > { %v879_v52 = vsel %vm421_vm2, %v525_v32, %v869_v50 }
 0x574   : > { %v873_v51 = vpop.permute.xlu0 %872 }
 0x575   : > { %v881_v53 = vsel %vm880_vm5, %v879_v52, %v873_v51 }
 0x57c   : > { %v877_v54 = vpop.permute.xlu1 %876 }
 0x57d   : > { %v883_v55 = vsel %vm882_vm6, %v881_v53, %v877_v54 }
 0x57e   : > { %v884_v56 = vpack.c.bf16 %v883_v55, %v883_v55 }
 0x580   : > { %1284 = vmatmul.mubr.msk.bf16.vlgmr.msra.gmra.mrb[16].mxu1 %vm368_vm1, %v884_v56 }
 0x653   : > { %v945_v60 = vpop.f32.mrb[16].mxu1 }
 0x654   : > { %v946_v61 = vadd.f32 %v1186_v59, %v945_v60  ;;  %v1285_v62 = vpop.f32.mrb[17].mxu1 }
 0x655   : > { %v948_v63 = vpop.f32.mrb[18].mxu1 }
 0x656   : > { %951 = vst.msk [vmem:[#allocation2] sm:$0xff] %vm368_vm1, %v946_v61  ;;  %v1286_v1 = vpop.f32.mrb[19].mxu1 }
 0x65d   : > { %v952_v2 = vld [vmem:[#allocation2] sm:$0xff] }
 0x65e   : > { %v953_v3 = vpack.c.bf16 %v952_v2, %v952_v2 }
 0x660   : > { %1292 = vmatmul.mubr.msk.bf16.vlgmr.msra.gmra.mrb[20].mxu0 %vm368_vm1, %v953_v3 }
 0x733   : > { %v1015_v4 = vpop.f32.mrb[20].mxu0 }
 0x734   : > { %v1016_v6 = vadd.f32 %v1190_v0, %v1015_v4  ;;  %v1293_v7 = vpop.f32.mrb[21].mxu0 }
 0x735   : > { %v1018_v8 = vpop.f32.mrb[22].mxu0 }
 0x736   : > { %1021 = vst [vmem:[%s342_s13] sm:$0xff] %v1016_v6  ;;  %v1294_v9 = vpop.f32.mrb[23].mxu0 }
 0x737   : > { %1555 = shalt.err (!%p1552_p0)
}
 0x738   : > { %s1556_s14 = scalar_lea.hbm %s2017_s8, 128  ;;  %s1560_s29 = scalar_lea.hbm %s2096_s17, 256 }
 0x739   : > { %p1557_p4 = scmp.ne.s32.totalorder %s2017_s8, %s1556_s14  ;;  %p1561_p1 = scmp.lt.u32.totalorder %s2017_s8, %s2096_s17 }
 0x73a   : > { %p1562_p12 = scmp.lt.u32.totalorder %s1560_s29, %s1556_s14  ;;  %p1564_p11 = scmp.lt.u32.totalorder %s1556_s14, %s2017_s8 }
 0x73b   : > { %p1558_p2 = pnand %p1557_p4, %p1852_p10 }
 0x73c   : > { %p1563_p13 = por %p1562_p12, %p1561_p1 }
 0x73d   : > { %p1559_p8 = pneg %p1558_p2 }
 0x73e   : > { %p1565_p6 = por %p1564_p11, %p1563_p13 }
 0x740   : > { %p1566_p3 = pnand %p1565_p6, %p1559_p8 }
 0x742   : > { %1569 = shalt.err (!%p1566_p3)
}
 0x743   : > { %1309 = dma.vmem_to_hbm [thread:$0]  (%p1852_p10), %s2019_s15, 128, %s2017_s8, %s1023_s20  }
 0x744 PF: > { %s2097_s30 = sld [smem:[#allocation16_spill]]  ;;  %s2098_s13 = sld [smem:[#allocation17_spill]] }
 0x745   : > { %p2100_p7 = scmp.ge.s32.totalorder %s1632_s26, 2 }
 0x74a   : > { %s1049_s11 = sand.u32 1, %s2097_s30   ;;  %p2099_p5 = scmp.ne.s32.totalorder %s2098_s13, 0 }
 0x74b   : > { %s1050_s16 = scalar_lea.sflag [#allocation5], %s1049_s11 }
 0x74c   : > { %p1326_p9 = pnand %p2100_p7, %p2099_p5 }
 0x74e   : > { %1607 = dma.done.wait (!%p1326_p9), %s1050_s16, 128  }
 0x74f   : > { %1609 = vsyncadd (!%p1326_p9), %s1050_s16, 4294967168  ;;  %s24_s26 = sadd.s32 1, %s1632_s26   ;;  %s2101_s21 = smov %s1616_s22 }
 0x750   : > { %p21_p0 = scmp.ge.s32.totalorder %s24_s26, 4   ;;  %s2102_s22 = smov %s1620_s23 }
 0x751   : > { %s2103_s23 = smov %s1864_s18  ;;  %s2104_s24 = smov %s1628_s25 }
 0x752   : > { %s2105_s25 = smov %s2107_s12  ;;  %23 = sbr.rel (!%p21_p0) target bundleno = 10 (0xa), region = 109 }
 0x759   :  { %1055 = vsyncpa [#allocation4], 1 }
 0x75a   :  { %1057 = vsyncpa [#allocation4 + $0x1], 1 }
 0x75b   :  { %1058 = vsyncpa [#allocation7], 1 }
 0x75c   :  { %1059 = vsyncpa [#allocation10], 1 }
 0x75d   :  { %1060 = vsyncpa [#allocation5], 1 }
 0x75e   :  { %1062 = vsyncpa [#allocation5 + $0x1], 1 }

</bundles_post_ra>
